<compile_context>
chip_gen: v5e
topology: v5e:2x2
jax: 0.10.0
libtpu: 0.0.40
codegen_flags: <defaults>
</compile_context>

<pallas_src>
import jax
import jax.numpy as jnp
from jax.experimental import pallas as pl
from jax.experimental.pallas import tpu as pltpu

_LANES = 128


def _skip_connection_kernel(x_ref, v_ref, o_ref):
    # Pure VPU elementwise add on one (TB, 128) tile.
    o_ref[...] = x_ref[...] + v_ref[...]


def _round_up(n: int, m: int) -> int:
    return ((n + m - 1) // m) * m


def skip_connection(x: jax.Array, value: jax.Array, *,
                    max_block_bytes: int = 2 * 1024 * 1024) -> jax.Array:
    """Pallas implementation of SkipConnection.forward: x + value."""
    assert x.shape == value.shape, "SkipConnection expects matching shapes"
    assert x.dtype == value.dtype, "SkipConnection expects matching dtypes"

    orig_shape = x.shape
    dtype = x.dtype
    itemsize = jnp.dtype(dtype).itemsize
    n = 1
    for d in orig_shape:
        n *= int(d)

    if n == 0:
        # Degenerate empty tensor: nothing to launch.
        return x + value

    # Sublane packing granularity: 8 rows for 4-byte, 16 for 2-byte, 32 for
    # 1-byte dtypes (sub-32-bit dtypes pack along the sublane axis).
    sublane = {4: 8, 2: 16, 1: 32}.get(itemsize, 8)

    # Rows of the lane-dense (rows, 128) slab.
    rows = pl.cdiv(n, _LANES)
    # Rows per block: ~max_block_bytes per buffer, rounded to sublane
    # granularity; never larger than the (padded) problem itself so small
    # inputs collapse to a single-block (grid=1) launch.
    tb = max(sublane,
             (max_block_bytes // (_LANES * itemsize)) // sublane * sublane)
    tb = min(tb, _round_up(rows, sublane))
    rows_padded = _round_up(rows, tb)
    n_padded = rows_padded * _LANES
    grid = rows_padded // tb

    def to_slab(a):
        flat = a.reshape(-1)
        if n_padded != n:
            flat = jnp.pad(flat, (0, n_padded - n))
        return flat.reshape(rows_padded, _LANES)

    x2 = to_slab(x)
    v2 = to_slab(value)

    grid_spec = pltpu.PrefetchScalarGridSpec(
        num_scalar_prefetch=0,
        grid=(grid,),
        in_specs=[
            pl.BlockSpec((tb, _LANES), lambda i: (i, 0)),
            pl.BlockSpec((tb, _LANES), lambda i: (i, 0)),
        ],
        out_specs=pl.BlockSpec((tb, _LANES), lambda i: (i, 0)),
    )
    out2 = pl.pallas_call(
        _skip_connection_kernel,
        out_shape=jax.ShapeDtypeStruct((rows_padded, _LANES), dtype),
        grid_spec=grid_spec,
        compiler_params=pltpu.CompilerParams(
            # Rows are independent -> shard the grid across v7x's 2 TCs.
            dimension_semantics=("parallel",),
        ),
        # input_output_aliases={0: 0} would drop the separate output
        # allocation; left off so callers remain free to reuse `x`.
    )(x2, v2)

    out = out2.reshape(-1)
    if n_padded != n:
        out = out[:n]
    return out.reshape(orig_shape)


if __name__ == "__main__":
    key = jax.random.PRNGKey(0)
    k_x, k_v, k_x2, k_v2 = jax.random.split(key, 4)

    # NeuMiss-style residual: [batch, n_features].
    batch, n_features = 4, 32
    x = jax.random.normal(k_x, (batch, n_features), dtype=jnp.float32)
    value = jax.random.normal(k_v, (batch, n_features), dtype=jnp.float32)

    out = jax.block_until_ready(skip_connection(x, value))
    ref = x + value
    assert out.shape == ref.shape and out.dtype == ref.dtype
    assert jnp.allclose(out, ref, atol=1e-6, rtol=1e-6)

    # Second small case: non-multiple-of-128 feature dim and a tiny block
    # budget to exercise the multi-block (grid > 1, pipelined) path.
    x2 = jax.random.normal(k_x2, (64, 300), dtype=jnp.float32)
    v2 = jax.random.normal(k_v2, (64, 300), dtype=jnp.float32)
    out2 = jax.block_until_ready(
        skip_connection(x2, v2, max_block_bytes=8 * 1024))
    ref2 = x2 + v2
    assert out2.shape == ref2.shape and out2.dtype == ref2.dtype
    assert jnp.allclose(out2, ref2, atol=1e-6, rtol=1e-6)

    print("KERNEL_OK")
</pallas_src>

<mosaic_0001>
module attributes {stable_mosaic.version = 11 : i64} {
  func.func @_skip_connection_kernel(%arg0: i32, %arg1: memref<8x128xf32, #tpu.memory_space<vmem>>, %arg2: memref<8x128xf32, #tpu.memory_space<vmem>>, %arg3: memref<8x128xf32, #tpu.memory_space<vmem>>) attributes {dimension_semantics = [#tpu.dimension_semantics<parallel>], iteration_bounds = array<i64: 1>, scalar_prefetch = 0 : i64, scratch_operands = 0 : i64, tpu.core_type = #tpu.core_type<tc>, window_params = [{transform_indices = @transform_0, window_bounds = array<i64: 8, 128>}, {transform_indices = @transform_1, window_bounds = array<i64: 8, 128>}, {transform_indices = @transform_2, window_bounds = array<i64: 8, 128>}]} {
    %c0 = arith.constant 0 : index
    %c0_0 = arith.constant 0 : index
    %0 = vector.load %arg1[%c0, %c0_0] : memref<8x128xf32, #tpu.memory_space<vmem>>, vector<8x128xf32>
    %c0_1 = arith.constant 0 : index
    %c0_2 = arith.constant 0 : index
    %1 = vector.load %arg2[%c0_1, %c0_2] : memref<8x128xf32, #tpu.memory_space<vmem>>, vector<8x128xf32>
    %2 = arith.addf %0, %1 : vector<8x128xf32>
    %c0_3 = arith.constant 0 : index
    %c0_4 = arith.constant 0 : index
    %3 = vector.load %arg3[%c0_3, %c0_4] : memref<8x128xf32, #tpu.memory_space<vmem>>, vector<8x128xf32>
    tpu.vector_store %arg3[%c0_3, %c0_4], %2 {strides = array<i32>} : memref<8x128xf32, #tpu.memory_space<vmem>>, vector<8x128xf32>,
    return
  }
  func.func @transform_0(%arg0: i32) -> (i32, i32) {
    %c0_i32 = arith.constant 0 : i32
    %c0_i32_0 = arith.constant 0 : i32
    return %arg0, %c0_i32 : i32, i32
  }
  func.func @transform_1(%arg0: i32) -> (i32, i32) {
    %c0_i32 = arith.constant 0 : i32
    %c0_i32_0 = arith.constant 0 : i32
    return %arg0, %c0_i32 : i32, i32
  }
  func.func @transform_2(%arg0: i32) -> (i32, i32) {
    %c0_i32 = arith.constant 0 : i32
    %c0_i32_0 = arith.constant 0 : i32
    return %arg0, %c0_i32 : i32, i32
  }
}

</mosaic_0001>

<bundles_post_ra>
// kernel: tpu_custom_call.1
= control target key start
LH: loop header
LB: loop body
LE: loop exit
PB: predicated region body
PF: predicated region fallthrough
CT: control target
= control target key end

     0   :  { %7 = vsyncpa [#allocation3], 0  ;;  %s170_s0 = inlined_call_operand.hbm [shape: f32[8,128], index: 0, kind: input, shape index: {}]   ;;  %s171_s1 = inlined_call_operand.hbm [shape: f32[8,128], index: 1, kind: input, shape index: {}]   ;;  %s172_s2 = inlined_call_operand.hbm [shape: f32[8,128], index: 2, kind: output, shape index: {}]  }
   0x1   :  { %8 = vsyncpa [#allocation6], 0 }
   0x2   :  { %9 = vsyncpa [#allocation4], 0  ;;  %s15_s11 = sshll.u32 %s170_s0, 4  ;;  %s143_s12 = smov [#allocation2]   ;;  %s16_s11 = int_to_ptr.hbm [resolvable:$true] %s15_s11 }
   0x3   :  { %s17_s13 = sshll.u32 %s143_s12, 4  ;;  %s26_s16 = sshll.u32 %s171_s1, 4  ;;  %s18_s13 = int_to_ptr.vmem [resolvable:$true] %s17_s13  ;;  %s27_s16 = int_to_ptr.hbm [resolvable:$true] %s26_s16 }
   0x4   :  { %20 = dma.hbm_to_vmem [thread:$0]  %s16_s11, 128, %s18_s13, [#allocation3]  }
   0x5   :  { %s144_s17 = smov [#allocation5]  }
   0x6   :  { %s28_s18 = sshll.u32 %s144_s17, 4  ;;  %s29_s18 = int_to_ptr.vmem [resolvable:$true] %s28_s18 }
   0x7   :  { %31 = dma.hbm_to_vmem [thread:$0]  %s27_s16, 128, %s29_s18, [#allocation6]  }
   0x8   :  { %137 = dma.done.wait [#allocation3], 128  }
   0x9   :  { %138 = vsyncadd [#allocation3], 4294967168 }
   0xa   :  { %139 = dma.done.wait [#allocation6], 128  }
   0xb   :  { %140 = vsyncadd [#allocation6], 4294967168  ;;  %s145_s19 = smov [#allocation7]   ;;  %s51_s22 = sshll.u32 %s172_s2, 4  ;;  %v40_v0 = vld [vmem:[#allocation2] sm:$0xff]  ;;  %v41_v1 = vld [vmem:[#allocation5] sm:$0xff]  ;;  %s52_s22 = int_to_ptr.hbm [resolvable:$true] %s51_s22 }
   0xc   :  { %s49_s0 = sshll.u32 %s145_s19, 4  ;;  %v42_v2 = vadd.f32 %v41_v1, %v40_v0  ;;  %s50_s0 = int_to_ptr.vmem [resolvable:$true] %s49_s0 }
   0xe   :  { %43 = vst [vmem:[#allocation7] sm:$0xff] %v42_v2 }
   0xf   :  { %54 = dma.vmem_to_hbm [thread:$0]  %s50_s0, 128, %s52_s22, [#allocation4]  }
  0x10   :  { %141 = dma.done.wait [#allocation4], 128  }
  0x11   :  { %142 = vsyncadd [#allocation4], 4294967168 }
  0x12   :  { %59 = vsyncpa [#allocation3], 1 }
  0x13   :  { %60 = vsyncpa [#allocation6], 1 }
  0x14   :  { %61 = vsyncpa [#allocation4], 1 }

</bundles_post_ra>
